<compile_context>
chip_gen: v5e
topology: v5e:2x2
jax: 0.10.0
libtpu: 0.0.40
codegen_flags: <defaults>
</compile_context>

<pallas_src>
import functools
from dataclasses import dataclass

import numpy as np
import jax
import jax.numpy as jnp
from jax.experimental import pallas as pl
from jax.experimental.pallas import tpu as pltpu

_LANE = 128
_MAX_F_TILE = 32768   # faces per grid step (2-D layout => ~6 MiB double-buffered VMEM)


def _round_up(x, m):
    return (x + m - 1) // m * m


def _cdiv(a, b):
    return -(-a // b)


# ----------------------------------------------------------------------------
# Pallas kernel: per-face edge-loss partials + analytic per-face gradients
# ----------------------------------------------------------------------------
def _icontour_kernel(scale_ref, v_ref, g_ref, lpart_ref):
    # v_ref: [9, F_TILE] f32, row = 3*slot + coord (faces on the lane axis)
    x = v_ref[...]
    v0 = x[0:3, :]
    v1 = x[3:6, :]
    v2 = x[6:9, :]

    e01 = v1 - v0                      # edge vectors (VPU elementwise)
    e12 = v2 - v1
    e20 = v0 - v2

    sq = e01 * e01 + e12 * e12 + e20 * e20          # [3, F_TILE]
    lpart_ref[0, 0] = jnp.sum(sq)                    # per-tile partial (XLU reduce)

    # analytic gradients of (weight * loss) wrt the first two face vertices;
    # g2 = -(g0 + g1) is reconstructed outside the kernel.
    s = scale_ref[0]                                 # = weight * 2 / (3F)
    g_ref[0:3, :] = s * (e20 - e01)                  # dL/dv0 per face
    g_ref[3:6, :] = s * (e01 - e12)                  # dL/dv1 per face


# ----------------------------------------------------------------------------
# host-side (static mesh) index tables
# ----------------------------------------------------------------------------
def _build_face_tables(faces_np, V, F, f_pad):
    faces_np = np.asarray(faces_np).astype(np.int64)
    # corner ordering j = slot*F + face  (matches faces.T.reshape(-1))
    idx = faces_np.T.reshape(-1)                                   # [3F]

    # slab gather indices into verts.reshape(-1):
    #   idx9[3*slot + coord, f] = faces[f, slot] * 3 + coord
    slot = np.zeros((3, f_pad), np.int64)
    slot[:, :F] = faces_np.T                                       # pad faces -> vertex 0 (zero edges)
    idx9 = (slot[:, None, :] * 3 + np.arange(3)[None, :, None]).reshape(9, f_pad)

    # vertex -> incident-corner table (CSR padded to max degree, sentinel = 3F)
    order = np.argsort(idx, kind="stable")
    sorted_idx = idx[order]
    deg = np.bincount(idx, minlength=V)
    dmax = max(int(deg.max()), 1)
    starts = np.zeros(V + 1, np.int64)
    starts[1:] = np.cumsum(deg)
    rank = np.arange(3 * F) - starts[sorted_idx]
    table = np.full((V, dmax), 3 * F, np.int32)                    # sentinel -> zero row
    table[sorted_idx, rank] = order.astype(np.int32)

    return jnp.asarray(idx9, dtype=jnp.int32), jnp.asarray(table)


# ----------------------------------------------------------------------------
# jitted core: gather slab -> Pallas kernel -> CSR gather+reduce to vertices
# ----------------------------------------------------------------------------
@functools.partial(jax.jit, static_argnames=("F", "f_tile"))
def _icontour_core(verts, weight, idx9, table, *, F, f_tile):
    verts = verts.astype(jnp.float32)
    f_pad = idx9.shape[1]
    num_tiles = f_pad // f_tile

    # single flat gather directly emits the lane-dense [9, f_pad] slab
    slab = jnp.take(verts.reshape(-1), idx9, axis=0)

    scale = (weight * (2.0 / (3.0 * F))).astype(jnp.float32).reshape(1)

    grads, lpart = pl.pallas_call(
        _icontour_kernel,
        out_shape=(
            jax.ShapeDtypeStruct((6, f_pad), jnp.float32),      # dL/dv0, dL/dv1
            jax.ShapeDtypeStruct((num_tiles, 1), jnp.float32),  # per-tile sum(sq)
        ),
        grid=(num_tiles,),
        in_specs=[
            pl.BlockSpec(memory_space=pltpu.MemorySpace.SMEM),  # scale (1,)
            pl.BlockSpec((9, f_tile), lambda i: (0, i)),
        ],
        out_specs=(
            pl.BlockSpec((6, f_tile), lambda i: (0, i)),
            pl.BlockSpec((1, 1), lambda i: (i, 0),
                         memory_space=pltpu.MemorySpace.SMEM),
        ),
        compiler_params=pltpu.CompilerParams(
            dimension_semantics=("parallel",),
            vmem_limit_bytes=32 * 1024 * 1024,
        ),
        cost_estimate=pl.CostEstimate(
            flops=48 * f_pad, transcendentals=0,
            bytes_accessed=(9 + 6) * 4 * f_pad),
    )(scale, slab)

    # loss = weight * mean over (3F) components of squared edge length
    loss = (weight / (3.0 * F)) * jnp.sum(lpart)

    # reconstruct g2 and scatter to vertices via CSR gather + dense reduce
    g9 = jnp.concatenate([grads, -(grads[0:3, :] + grads[3:6, :])], axis=0)  # [9, f_pad]
    zero = jnp.zeros((1,), jnp.float32)

    def per_coord(c):
        # corner-major vector for coordinate c (order j = slot*F + face), + sentinel 0
        flat = jnp.concatenate([g9[c::3, :F].reshape(-1), zero])    # [3F + 1]
        return jnp.take(flat, table, axis=0).sum(axis=1)            # [V]

    grad = jnp.stack([per_coord(0), per_coord(1), per_coord(2)], axis=1)  # [V, 3]
    # grad[grad != grad] = 0
    grad = jnp.where(jnp.isnan(grad), jnp.float32(0.0), grad)
    return loss, grad


def icontour_loss_and_grad(verts, faces, weight, f_tile=None):
    """verts: [V,3] f32, faces: [F,3] int, weight: python float / scalar.
    Returns (scalar loss, [V,3] gradient), both already scaled by `weight`."""
    faces_np = np.asarray(faces)
    F = int(faces_np.shape[0])
    V = int(verts.shape[0])

    f_lanes = _round_up(max(F, 1), _LANE)
    if f_tile is None:
        if f_lanes <= _LANE:
            f_tile = _LANE                                   # tiny mesh: single tile
        else:
            # >=2 tiles so both v7x TensorCores get work, <=32768 faces per tile
            nt = max(2, _cdiv(f_lanes, _MAX_F_TILE))
            f_tile = _round_up(_cdiv(f_lanes, nt), _LANE)
    else:
        f_tile = _round_up(int(f_tile), _LANE)
    f_pad = _round_up(f_lanes, f_tile)

    # TODO(synk): `faces` is static per mesh in the original pipeline; cache these
    # tables across iterations instead of rebuilding them every call.
    idx9, table = _build_face_tables(faces_np, V, F, f_pad)

    return _icontour_core(jnp.asarray(verts), jnp.float32(weight), idx9, table,
                          F=F, f_tile=f_tile)


# ----------------------------------------------------------------------------
# Criterion module (JAX/Pallas port)
# ----------------------------------------------------------------------------
@dataclass
class MCfg:
    step_start: int = 0
    step_max: int = 100
    weight_start: float = 0.0
    weight_max: float = 1.0
    enable_attractions: bool = True
    detach_coords: bool = False
    detach_coeffs: bool = False
    detach_aux_bary: bool = False
    detach_aux_edges: bool = False
    only_edgeloss: bool = False


class Criterion:
    def __init__(self, mcfg):
        self.mcfg = mcfg
        self.name = 'icontour'

    def get_weight(self, it):
        n_rampup_iterations = self.mcfg.step_max - self.mcfg.step_start
        it = it - self.mcfg.step_start
        it = max(it, 0)
        progress = it / n_rampup_iterations
        progress = min(progress, 1.0)
        return self.mcfg.weight_start + (
            self.mcfg.weight_max - self.mcfg.weight_start) * progress

    def forward(self, sample):
        iter_num = int(sample['iter'])
        weight = self.get_weight(iter_num)
        n_attraction_edges = int(sample['n_attraction_edges'])

        if weight == 0 or not self.mcfg.enable_attractions:
            return dict(loss=jnp.zeros((1,), jnp.float32), weight=weight)
        if n_attraction_edges == 0:
            return dict(loss=jnp.zeros((1,), jnp.float32), weight=weight)
        if int(sample['step']) == 0:
            return dict(loss=jnp.zeros((1,), jnp.float32), weight=weight)

        verts = sample['pred_pos']          # [V, 3]
        faces = sample['faces']             # [F, 3]
        loss, grad = icontour_loss_and_grad(verts, faces, weight)
        return dict(loss=loss, weight=weight, gradient=grad)


# ----------------------------------------------------------------------------
# reference (pure JAX) for validation
# ----------------------------------------------------------------------------
def _ref_loss(verts, faces):
    v0 = verts[faces[:, 0]]
    v1 = verts[faces[:, 1]]
    v2 = verts[faces[:, 2]]
    sq = (v1 - v0) ** 2 + (v2 - v1) ** 2 + (v0 - v2) ** 2
    return jnp.sum(sq) / (3.0 * faces.shape[0])


if __name__ == "__main__":
    # --- small deterministic case through the full Criterion path ---
    key = jax.random.PRNGKey(0)
    V, F = 16, 8
    verts = jax.random.normal(key, (V, 3), dtype=jnp.float32)
    idx = jnp.arange(F, dtype=jnp.int32)
    faces = jnp.stack([idx, (idx + 1) % V, (idx + 2) % V], axis=1)

    sample = dict(
        pred_pos=verts,
        faces=faces,
        iter=50,                 # halfway through ramp-up -> weight 0.5
        step=1,
        n_attraction_edges=8,
        num_graphs=1,
    )

    crit = Criterion(MCfg())
    out = crit.forward(sample)
    jax.block_until_ready(out['loss'])
    jax.block_until_ready(out['gradient'])

    w = out['weight']
    ref_l = _ref_loss(verts, faces) * w
    ref_g = jax.grad(lambda v: _ref_loss(v, faces) * w)(verts)
    assert jnp.allclose(out['loss'], ref_l, rtol=1e-5, atol=1e-6)
    assert jnp.allclose(out['gradient'], ref_g, rtol=1e-5, atol=1e-5)
    assert bool(jnp.all(jnp.isfinite(out['gradient'])))

    # --- multi-tile + padding exercise (3 grid tiles with f_tile=128) ---
    verts2 = jax.random.normal(jax.random.PRNGKey(1), (64, 3), dtype=jnp.float32)
    faces2 = jax.random.randint(jax.random.PRNGKey(2), (300, 3), 0, 64,
                                dtype=jnp.int32)
    w2 = 0.7
    l2, grad2 = icontour_loss_and_grad(verts2, faces2, w2, f_tile=128)
    jax.block_until_ready(grad2)
    ref_l2 = _ref_loss(verts2, faces2) * w2
    ref_g2 = jax.grad(lambda v: _ref_loss(v, faces2) * w2)(verts2)
    assert jnp.allclose(l2, ref_l2, rtol=1e-5, atol=1e-6)
    assert jnp.allclose(grad2, ref_g2, rtol=1e-5, atol=1e-5)

    # --- default (auto) tiling path on the same mesh, different weight ---
    l3, grad3 = icontour_loss_and_grad(verts2, faces2, 0.25)
    jax.block_until_ready(grad3)
    assert jnp.allclose(l3, _ref_loss(verts2, faces2) * 0.25, rtol=1e-5, atol=1e-6)

    print("KERNEL_OK")
</pallas_src>

<mosaic_0001>
module attributes {stable_mosaic.version = 11 : i64} {
  func.func @_icontour_kernel(%arg0: i32, %arg1: memref<1xf32, #tpu.memory_space<smem>>, %arg2: memref<9x128xf32, #tpu.memory_space<vmem>>, %arg3: memref<6x128xf32, #tpu.memory_space<vmem>>, %arg4: memref<1x1xf32, #tpu.memory_space<smem>>) attributes {dimension_semantics = [#tpu.dimension_semantics<parallel>], iteration_bounds = array<i64: 1>, scalar_prefetch = 0 : i64, scratch_operands = 0 : i64, tpu.core_type = #tpu.core_type<tc>, window_params = [{transform_indices = @transform_0, window_bounds = array<i64: 1>}, {transform_indices = @transform_1, window_bounds = array<i64: 9, 128>}, {transform_indices = @transform_2, window_bounds = array<i64: 6, 128>}, {transform_indices = @transform_3, window_bounds = array<i64: 1, 1>}]} {
    %c0 = arith.constant 0 : index
    %c0_0 = arith.constant 0 : index
    %0 = vector.load %arg2[%c0, %c0_0] : memref<9x128xf32, #tpu.memory_space<vmem>>, vector<9x128xf32>
    %1 = vector.extract_strided_slice %0 {offsets = [0, 0], sizes = [3, 128], strides = [1, 1]} : vector<9x128xf32> to vector<3x128xf32>
    %2 = vector.extract_strided_slice %0 {offsets = [3, 0], sizes = [3, 128], strides = [1, 1]} : vector<9x128xf32> to vector<3x128xf32>
    %3 = vector.extract_strided_slice %0 {offsets = [6, 0], sizes = [3, 128], strides = [1, 1]} : vector<9x128xf32> to vector<3x128xf32>
    %4 = arith.subf %2, %1 : vector<3x128xf32>
    %5 = arith.subf %3, %2 : vector<3x128xf32>
    %6 = arith.subf %1, %3 : vector<3x128xf32>
    %7 = arith.mulf %4, %4 : vector<3x128xf32>
    %8 = arith.mulf %5, %5 : vector<3x128xf32>
    %9 = arith.addf %7, %8 : vector<3x128xf32>
    %10 = arith.mulf %6, %6 : vector<3x128xf32>
    %11 = arith.addf %9, %10 : vector<3x128xf32>
    %12 = vector.shape_cast %11 : vector<3x128xf32> to vector<1x3x128xf32>
    %cst = arith.constant dense<0.000000e+00> : vector<1xf32>
    %13 = vector.multi_reduction <add>, %12, %cst [1, 2] : vector<1x3x128xf32> to vector<1xf32>
    %14 = vector.shape_cast %13 : vector<1xf32> to vector<1x1x1xf32>
    %15 = vector.extract %14[0, 0, 0] : f32 from vector<1x1x1xf32>
    %c0_1 = arith.constant 0 : index
    %c0_2 = arith.constant 0 : index
    %16 = memref.load %arg4[%c0_1, %c0_2] : memref<1x1xf32, #tpu.memory_space<smem>>
    memref.store %15, %arg4[%c0_1, %c0_2] : memref<1x1xf32, #tpu.memory_space<smem>>
    %c0_3 = arith.constant 0 : index
    %17 = memref.load %arg1[%c0_3] : memref<1xf32, #tpu.memory_space<smem>>
    %18 = arith.subf %6, %4 : vector<3x128xf32>
    %19 = vector.broadcast %17 : f32 to vector<3x128xf32>
    %20 = arith.mulf %19, %18 : vector<3x128xf32>
    %c0_4 = arith.constant 0 : index
    %c0_5 = arith.constant 0 : index
    %21 = vector.load %arg3[%c0_4, %c0_5] : memref<6x128xf32, #tpu.memory_space<vmem>>, vector<3x128xf32>
    tpu.vector_store %arg3[%c0_4, %c0_5], %20 {strides = array<i32>} : memref<6x128xf32, #tpu.memory_space<vmem>>, vector<3x128xf32>,
    %22 = arith.subf %4, %5 : vector<3x128xf32>
    %23 = vector.broadcast %17 : f32 to vector<3x128xf32>
    %24 = arith.mulf %23, %22 : vector<3x128xf32>
    %c3 = arith.constant 3 : index
    %c0_6 = arith.constant 0 : index
    %25 = vector.load %arg3[%c3, %c0_6] : memref<6x128xf32, #tpu.memory_space<vmem>>, vector<3x128xf32>
    tpu.vector_store %arg3[%c3, %c0_6], %24 {strides = array<i32>} : memref<6x128xf32, #tpu.memory_space<vmem>>, vector<3x128xf32>,
    return
  }
  func.func @transform_0(%arg0: i32) -> i32 {
    %c0_i32 = arith.constant 0 : i32
    %c0_i32_0 = arith.constant 0 : i32
    return %c0_i32 : i32
  }
  func.func @transform_1(%arg0: i32) -> (i32, i32) {
    %c0_i32 = arith.constant 0 : i32
    %c0_i32_0 = arith.constant 0 : i32
    return %c0_i32, %arg0 : i32, i32
  }
  func.func @transform_2(%arg0: i32) -> (i32, i32) {
    %c0_i32 = arith.constant 0 : i32
    %c0_i32_0 = arith.constant 0 : i32
    return %c0_i32, %arg0 : i32, i32
  }
  func.func @transform_3(%arg0: i32) -> (i32, i32) {
    %c0_i32 = arith.constant 0 : i32
    %c0_i32_0 = arith.constant 0 : i32
    return %arg0, %c0_i32 : i32, i32
  }
}

</mosaic_0001>

<bundles_post_ra>
// kernel: _icontour_core.1
= control target key start
LH: loop header
LB: loop body
LE: loop exit
PB: predicated region body
PF: predicated region fallthrough
CT: control target
= control target key end

     0   :  { %vm23_vm0 = vcmask 1041408   ;;  %s150_s0 = inlined_call_operand.<no memory space> [shape: f32[1], index: 0, kind: input, shape index: {}]   ;;  %s151_s1 = inlined_call_operand.vmem [shape: f32[9,128], index: 1, kind: input, shape index: {}]   ;;  %s152_s2 = inlined_call_operand.vmem [shape: f32[6,128], index: 2, kind: output, shape index: {0}]   ;;  %s153_s3 = inlined_call_operand.hbm [shape: f32[1,1], index: 3, kind: output, shape index: {1}]  }
   0x1   :  { %v15_v0 = vld [vmem:[%s151_s1] sm:$0xff]  ;;  %v16_v1 = vld [vmem:[%s151_s1 + $0x8] sm:$0x1] }
   0x2   :  { %v18_v2 = vrot.slane %v15_v0, 5  ;;  %v24_v3 = vrot.slane %v15_v0, 6  ;;  %v25_v4 = vrot.slane %v16_v1, 6 }
   0x3   :  { %10 = vsyncpa [#allocation4], 0  ;;  %vm33_vm1 = vcmask 1044480   ;;  %v65_v14 = vstv %s150_s0  ;;  %vm47_vm2 = vcmask 1042432   ;;  %s82_s22 = sshll.u32 %s153_s3, 4  ;;  %s83_s22 = int_to_ptr.hbm [resolvable:$true] %s82_s22 }
   0x4   :  { %v20_v5 = vsub.f32 %v15_v0, %v18_v2  ;;  %v21_v6 = vsub.f32 %v16_v1, %v18_v2  ;;  %v26_v7 = vsel %vm23_vm0, %v24_v3, %v25_v4 }
   0x5   :  { %v28_v8 = vsub.f32 %v15_v0, %v26_v7 }
   0x6   :  { %v29_v9 = vmul.f32 %v20_v5, %v20_v5  ;;  %v30_v10 = vmul.f32 %v21_v6, %v21_v6  ;;  %v62_v11 = vrot.slane %v20_v5, 3  ;;  %v69_v12 = vrot.slane %v21_v6, 3 }
   0x7   :  { %v39_v13 = vmul.f32 %v28_v8, %v28_v8 }
   0x8   :  { %v34_v15 = vrot.slane %v29_v9, 3  ;;  %v35_v16 = vrot.slane %v30_v10, 3  ;;  %v64_v17 = vsub.f32 %v28_v8, %v62_v11  ;;  %v70_v18 = vsel %vm33_vm1, %v62_v11, %v69_v12 }
   0x9   :  { %v41_v19 = vrot.slane %v39_v13, 5  ;;  %v72_v20 = vsub.f32 %v20_v5, %v70_v18 }
   0xa   :  { %v36_v21 = vsel %vm33_vm1, %v34_v15, %v35_v16  ;;  %v66_v22 = vmul.f32 %v65_v14, %v64_v17 }
   0xb   :  { %v38_v23 = vadd.f32 %v36_v21, %v29_v9  ;;  %v73_v24 = vmul.f32 %v72_v20, %v65_v14 }
   0xc   :  { %67 = vst [vmem:[%s152_s2] sm:$0x7] %v66_v22 }
   0xd   :  { %v43_v25 = vadd.f32 %v41_v19, %v38_v23  ;;  %74 = vst [vmem:[%s152_s2] sm:$0x38] %v73_v24  ;;  %s111_s2 = smov [#allocation3]  }
   0xf   :  { %v45_v26 = vrot.slane %v43_v25, 3 }
  0x11   :  { %v48_v27 = vsel %vm47_vm2, %v45_v26, 0.0 }
  0x12   :  { %49 = vadd.xlane.f32.xlu0 %v48_v27 }
  0x85   :  { %v50_v28 = vpop.xlane.xlu0 %49 }
  0x86   :  { %v51_v29 = vrot.slane %v50_v28, 4 }
  0x88   :  { %v52_v30 = vadd.f32 %v51_v29, %v50_v28 }
  0x8a   :  { %v53_v31 = vrot.slane %v52_v30, 2 }
  0x8c   :  { %v54_v32 = vadd.f32 %v53_v31, %v52_v30 }
  0x8e   :  { %v55_v33 = vrot.slane %v54_v32, 1 }
  0x90   :  { %v56_v34 = vadd.f32 %v55_v33, %v54_v32 }
  0x92   :  { %94 = vpush %v56_v34 }
  0xc3   :  { %s95_s23 = spop %94 }
  0xc4   :  { %59 = sst [smem:[#allocation3]] %s95_s23 }
  0xc5   :  { %85 = dma.smem_to_hbm %s111_s2, 16, %s83_s22, [#allocation4]  }
  0xc6   :  { %109 = dma.done.wait [#allocation4], 16  }
  0xc7   :  { %110 = vsyncadd [#allocation4], 4294967280 }
  0xc8   :  { %92 = sfence }
  0xc9   :  { %93 = vsyncpa [#allocation4], 1 }

</bundles_post_ra>
